<compile_context>
chip_gen: v5e
topology: v5e:2x2
jax: 0.10.0
libtpu: 0.0.40
codegen_flags: <defaults>
</compile_context>

<pallas_src>
import functools

import jax
import jax.numpy as jnp
from jax.experimental import pallas as pl
from jax.experimental.pallas import tpu as pltpu


# Lane-dense minor dim: large multiple of 128 -> full-vreg, unmasked vld/vst.
_LANE_WIDTH = 512
# 512x512 f32 block = 1 MiB per input; 2 inputs x 2 pipeline buffers ~= 4 MiB.
_MAX_BLOCK_ROWS = 512
# Below this element count, pallas_call launch overhead dominates.
_SMALL_N = 8 * _LANE_WIDTH


def _round_up(x, m):
    return ((x + m - 1) // m) * m


def _smooth_l1_ref(pred, true):
    """Pure-jnp SmoothL1 (beta=1) mean — small-input fallback & reference."""
    d = pred.astype(jnp.float32) - true.astype(jnp.float32)
    ad = jnp.abs(d)
    return jnp.mean(jnp.where(ad < 1.0, 0.5 * d * d, ad - 0.5))


def _smooth_l1_mean_kernel(pred_ref, true_ref, out_ref, acc_ref, *, inv_count):
    i = pl.program_id(0)

    @pl.when(i == 0)
    def _init():
        acc_ref[...] = jnp.zeros_like(acc_ref)

    pred = pred_ref[...].astype(jnp.float32)
    true = true_ref[...].astype(jnp.float32)
    diff = pred - true
    ad = jnp.abs(diff)
    # SmoothL1 with beta = 1.0 (PyTorch default):
    #   0.5 * d^2   if |d| < 1
    #   |d| - 0.5   otherwise
    elem = jnp.where(ad < 1.0, 0.5 * diff * diff, ad - 0.5)

    # Fold this block's rows down to a vreg-height (8, LANE) partial sum:
    # pure VPU adds across vregs (lanes untouched, no relayout). The single
    # cross-lane/sublane reduce happens only once, in the epilogue below.
    rows, lanes = elem.shape
    acc_ref[...] += elem.reshape(rows // 8, 8, lanes).sum(axis=0)

    @pl.when(i == pl.num_programs(0) - 1)
    def _finalize():
        # Divide by the TRUE (unpadded) element count.
        out_ref[0, 0] = jnp.sum(acc_ref[...]) * jnp.float32(inv_count)


def _smooth_l1_mean(pred, true):
    pred = jnp.ravel(jnp.asarray(pred))
    true = jnp.ravel(jnp.asarray(true))
    n = pred.size

    # Tiny inputs: launch overhead dwarfs the work — let XLA fuse it.
    if n < _SMALL_N:
        return _smooth_l1_ref(pred, true)

    rows = pl.cdiv(n, _LANE_WIDTH)
    block_rows = min(_MAX_BLOCK_ROWS, _round_up(rows, 8))
    rows_padded = _round_up(rows, block_rows)
    n_padded = rows_padded * _LANE_WIDTH

    pad = n_padded - n
    if pad:
        # Zero-pad BOTH operands: padded diffs are exactly 0 -> contribute 0.
        pred = jnp.pad(pred, (0, pad))
        true = jnp.pad(true, (0, pad))

    pred2 = pred.reshape(rows_padded, _LANE_WIDTH)
    true2 = true.reshape(rows_padded, _LANE_WIDTH)
    grid = (rows_padded // block_rows,)

    kernel = functools.partial(_smooth_l1_mean_kernel, inv_count=1.0 / n)

    # TODO(synk): on v7x a 2-way core-parallel leading grid axis (two partial
    # sums combined in the wrapper) could better saturate the ~3.2 TB/s HBM.
    out = pl.pallas_call(
        kernel,
        out_shape=jax.ShapeDtypeStruct((1, 1), jnp.float32),
        grid_spec=pltpu.PrefetchScalarGridSpec(
            num_scalar_prefetch=0,
            grid=grid,
            in_specs=[
                pl.BlockSpec((block_rows, _LANE_WIDTH), lambda i: (i, 0)),
                pl.BlockSpec((block_rows, _LANE_WIDTH), lambda i: (i, 0)),
            ],
            out_specs=pl.BlockSpec(
                (1, 1), lambda i: (0, 0), memory_space=pltpu.SMEM
            ),
            scratch_shapes=[pltpu.VMEM((8, _LANE_WIDTH), jnp.float32)],
        ),
        compiler_params=pltpu.CompilerParams(
            dimension_semantics=("arbitrary",)
        ),
    )(pred2, true2)
    return out[0, 0]


def custom_loss_forward(hit_miss_pred, rgb_pred, hit_miss_true, rgb_true):
    """Mirror of CustomLoss.forward.

    The BCE classification loss and the hit-masked SmoothL1 loss are computed
    in the PyTorch module but their result is discarded; the forward returns
    exactly SmoothL1Loss(rgb_pred, rgb_true), which is what we compute here.
    (The module's unsqueeze(1) of 1-D inputs does not change the mean, and
    the wrapper flattens anyway.)
    """
    # TODO(synk): BCE + masked rgb loss are dead code in the original forward
    # (their result is never returned), so they are intentionally not emitted.
    del hit_miss_pred, hit_miss_true
    return _smooth_l1_mean(rgb_pred, rgb_true)


if __name__ == "__main__":
    key = jax.random.PRNGKey(0)
    k1, k2, k3, k4, k5, k6 = jax.random.split(key, 6)

    # --- Test 1: module-scale tiny input (8, 3) -> jnp fallback path. -------
    N, C = 8, 3
    hm_pred = jax.nn.sigmoid(jax.random.normal(k1, (N,), jnp.float32))
    hm_true = (jax.random.uniform(k2, (N,)) > 0.5).astype(jnp.float32)
    rgb_pred = jax.random.normal(k3, (N, C), jnp.float32)
    rgb_true = jax.random.normal(k4, (N, C), jnp.float32)

    loss_small = custom_loss_forward(hm_pred, rgb_pred, hm_true, rgb_true)
    loss_small = jax.block_until_ready(loss_small)
    ref_small = _smooth_l1_ref(rgb_pred, rgb_true)
    assert jnp.allclose(loss_small, ref_small, rtol=1e-6, atol=1e-6), (
        loss_small, ref_small)

    # --- Test 2: (4096, 3) f32 -> Pallas kernel path (single grid step,
    #             padding correction on the mean). --------------------------
    N2, C2 = 4096, 3
    rgb_pred2 = jax.random.normal(k5, (N2, C2), jnp.float32)
    rgb_true2 = jax.random.normal(k6, (N2, C2), jnp.float32)
    hm2 = jnp.zeros((N2,), jnp.float32)

    loss_med = custom_loss_forward(hm2, rgb_pred2, hm2, rgb_true2)
    loss_med = jax.block_until_ready(loss_med)
    ref_med = _smooth_l1_ref(rgb_pred2, rgb_true2)
    assert jnp.allclose(loss_med, ref_med, rtol=1e-5, atol=1e-6), (
        loss_med, ref_med)

    # --- Test 3: 1-D bf16 inputs, 600k elements -> multi-step grid,
    #             in-kernel bf16 -> f32 upcast, accumulator across steps. ---
    N3 = 600_000
    ka, kb = jax.random.split(k5)
    p3 = jax.random.normal(ka, (N3,), jnp.float32).astype(jnp.bfloat16)
    t3 = jax.random.normal(kb, (N3,), jnp.float32).astype(jnp.bfloat16)
    hm3 = jnp.zeros((N3,), jnp.float32)

    loss_big = custom_loss_forward(hm3, p3, hm3, t3)
    loss_big = jax.block_until_ready(loss_big)
    ref_big = _smooth_l1_ref(p3, t3)
    assert jnp.allclose(loss_big, ref_big, rtol=1e-5, atol=1e-6), (
        loss_big, ref_big)

    print("KERNEL_OK")
</pallas_src>

<mosaic_0001>
module attributes {stable_mosaic.version = 11 : i64} {
  func.func @_smooth_l1_mean_kernel(%arg0: i32, %arg1: memref<24x512xf32, #tpu.memory_space<vmem>>, %arg2: memref<24x512xf32, #tpu.memory_space<vmem>>, %arg3: memref<1x1xf32, #tpu.memory_space<smem>>, %arg4: memref<8x512xf32, #tpu.memory_space<vmem>>) attributes {dimension_semantics = [#tpu.dimension_semantics<arbitrary>], iteration_bounds = array<i64: 1>, scalar_prefetch = 0 : i64, scratch_operands = 1 : i64, tpu.core_type = #tpu.core_type<tc>, window_params = [{transform_indices = @transform_0, window_bounds = array<i64: 24, 512>}, {transform_indices = @transform_1, window_bounds = array<i64: 24, 512>}, {transform_indices = @transform_2, window_bounds = array<i64: 1, 1>}]} {
    %c0_i32 = arith.constant 0 : i32
    %0 = arith.cmpi eq, %arg0, %c0_i32 : i32
    %1 = arith.extui %0 : i1 to i32
    %c0_i32_0 = arith.constant 0 : i32
    %2 = arith.cmpi ne, %1, %c0_i32_0 : i32
    scf.if %2 {
      %cst_13 = arith.constant 0.000000e+00 : f32
      %23 = vector.broadcast %cst_13 : f32 to vector<8x512xf32>
      %c0_14 = arith.constant 0 : index
      %c0_15 = arith.constant 0 : index
      %24 = vector.load %arg4[%c0_14, %c0_15] : memref<8x512xf32, #tpu.memory_space<vmem>>, vector<8x512xf32>
      tpu.vector_store %arg4[%c0_14, %c0_15], %23 {strides = array<i32>} : memref<8x512xf32, #tpu.memory_space<vmem>>, vector<8x512xf32>,
    } else {
    }
    %c0 = arith.constant 0 : index
    %c0_1 = arith.constant 0 : index
    %3 = vector.load %arg1[%c0, %c0_1] : memref<24x512xf32, #tpu.memory_space<vmem>>, vector<24x512xf32>
    %c0_2 = arith.constant 0 : index
    %c0_3 = arith.constant 0 : index
    %4 = vector.load %arg2[%c0_2, %c0_3] : memref<24x512xf32, #tpu.memory_space<vmem>>, vector<24x512xf32>
    %5 = arith.subf %3, %4 : vector<24x512xf32>
    %6 = math.absf %5 : vector<24x512xf32>
    %cst = arith.constant 1.000000e+00 : f32
    %7 = vector.broadcast %cst : f32 to vector<24x512xf32>
    %8 = arith.cmpf olt, %6, %7 : vector<24x512xf32>
    %cst_4 = arith.constant 5.000000e-01 : f32
    %9 = vector.broadcast %cst_4 : f32 to vector<24x512xf32>
    %10 = arith.mulf %9, %5 : vector<24x512xf32>
    %11 = arith.mulf %10, %5 : vector<24x512xf32>
    %cst_5 = arith.constant 5.000000e-01 : f32
    %12 = vector.broadcast %cst_5 : f32 to vector<24x512xf32>
    %13 = arith.subf %6, %12 : vector<24x512xf32>
    %14 = arith.select %8, %11, %13 : vector<24x512xi1>, vector<24x512xf32>
    %c0_6 = arith.constant 0 : index
    %c0_7 = arith.constant 0 : index
    %15 = vector.load %arg4[%c0_6, %c0_7] : memref<8x512xf32, #tpu.memory_space<vmem>>, vector<8x512xf32>
    %16 = vector.shape_cast %14 : vector<24x512xf32> to vector<3x8x512xf32>
    %cst_8 = arith.constant dense<0.000000e+00> : vector<8x512xf32>
    %17 = vector.multi_reduction <add>, %16, %cst_8 [0] : vector<3x8x512xf32> to vector<8x512xf32>
    %18 = arith.addf %15, %17 : vector<8x512xf32>
    %c0_9 = arith.constant 0 : index
    %c0_10 = arith.constant 0 : index
    %19 = vector.load %arg4[%c0_9, %c0_10] : memref<8x512xf32, #tpu.memory_space<vmem>>, vector<8x512xf32>
    tpu.vector_store %arg4[%c0_9, %c0_10], %18 {strides = array<i32>} : memref<8x512xf32, #tpu.memory_space<vmem>>, vector<8x512xf32>,
    %c0_i32_11 = arith.constant 0 : i32
    %20 = arith.cmpi eq, %arg0, %c0_i32_11 : i32
    %21 = arith.extui %20 : i1 to i32
    %c0_i32_12 = arith.constant 0 : i32
    %22 = arith.cmpi ne, %21, %c0_i32_12 : i32
    scf.if %22 {
      %c0_13 = arith.constant 0 : index
      %c0_14 = arith.constant 0 : index
      %23 = vector.load %arg4[%c0_13, %c0_14] : memref<8x512xf32, #tpu.memory_space<vmem>>, vector<8x512xf32>
      %24 = vector.shape_cast %23 : vector<8x512xf32> to vector<1x8x512xf32>
      %cst_15 = arith.constant dense<0.000000e+00> : vector<1xf32>
      %25 = vector.multi_reduction <add>, %24, %cst_15 [1, 2] : vector<1x8x512xf32> to vector<1xf32>
      %26 = vector.shape_cast %25 : vector<1xf32> to vector<1x1x1xf32>
      %27 = vector.extract %26[0, 0, 0] : f32 from vector<1x1x1xf32>
      %cst_16 = arith.constant 8.13802107E-5 : f32
      %28 = arith.mulf %27, %cst_16 : f32
      %c0_17 = arith.constant 0 : index
      %c0_18 = arith.constant 0 : index
      %29 = memref.load %arg3[%c0_17, %c0_18] : memref<1x1xf32, #tpu.memory_space<smem>>
      memref.store %28, %arg3[%c0_17, %c0_18] : memref<1x1xf32, #tpu.memory_space<smem>>
    } else {
    }
    return
  }
  func.func @transform_0(%arg0: i32) -> (i32, i32) {
    %c0_i32 = arith.constant 0 : i32
    %c0_i32_0 = arith.constant 0 : i32
    return %arg0, %c0_i32 : i32, i32
  }
  func.func @transform_1(%arg0: i32) -> (i32, i32) {
    %c0_i32 = arith.constant 0 : i32
    %c0_i32_0 = arith.constant 0 : i32
    return %arg0, %c0_i32 : i32, i32
  }
  func.func @transform_2(%arg0: i32) -> (i32, i32) {
    %c0_i32 = arith.constant 0 : i32
    %c0_i32_0 = arith.constant 0 : i32
    %c0_i32_1 = arith.constant 0 : i32
    return %c0_i32, %c0_i32_0 : i32, i32
  }
}

</mosaic_0001>

<bundles_post_ra>
// kernel: tpu_custom_call.1
= control target key start
LH: loop header
LB: loop body
LE: loop exit
PB: predicated region body
PF: predicated region fallthrough
CT: control target
= control target key end

     0   :  { %7 = vsyncpa [#allocation4], 0  ;;  %s435_s0 = inlined_call_operand.hbm [shape: f32[24,512], index: 0, kind: input, shape index: {}]   ;;  %s436_s1 = inlined_call_operand.hbm [shape: f32[24,512], index: 1, kind: input, shape index: {}]   ;;  %s437_s2 = inlined_call_operand.hbm [shape: f32[1,1], index: 2, kind: output, shape index: {}]  }
   0x1   :  { %8 = vsyncpa [#allocation7], 0 }
   0x2   :  { %9 = vsyncpa [#allocation5], 0  ;;  %s14_s11 = sshll.u32 %s435_s0, 4  ;;  %s304_s12 = smov [#allocation3]   ;;  %s15_s11 = int_to_ptr.hbm [resolvable:$true] %s14_s11 }
   0x3   :  { %s16_s13 = sshll.u32 %s304_s12, 4  ;;  %s27_s16 = sshll.u32 %s436_s1, 4  ;;  %s17_s13 = int_to_ptr.vmem [resolvable:$true] %s16_s13  ;;  %s28_s16 = int_to_ptr.hbm [resolvable:$true] %s27_s16 }
   0x4   :  { %s305_s17 = smov 512   ;;  %s306_s18 = smov 32  }
   0x5   :  { %22 = dma.hbm_to_vmem [thread:$0]  %s15_s11, 1536, %s17_s13, [#allocation4], %s305_s17, %s305_s17, %s306_s18  }
   0x6   :  { %s307_s19 = smov [#allocation6]  }
   0x7   :  { %s29_s20 = sshll.u32 %s307_s19, 4  ;;  %s30_s20 = int_to_ptr.vmem [resolvable:$true] %s29_s20 }
   0x8   :  { %35 = dma.hbm_to_vmem [thread:$0]  %s28_s16, 1536, %s30_s20, [#allocation7], %s305_s17, %s305_s17, %s306_s18  }
   0x9   :  { %298 = dma.done.wait [#allocation4], 1536  }
   0xa   :  { %299 = vsyncadd [#allocation4], 4294965760 }
   0xb   :  { %300 = dma.done.wait [#allocation7], 1536  }
   0xc   :  { %301 = vsyncadd [#allocation7], 4294965760  ;;  %v52_v0 = vld [vmem:[#allocation3] sm:$0xff]  ;;  %v53_v1 = vld [vmem:[#allocation3 + $0x8] sm:$0xff]  ;;  %s207_s21 = sshll.u32 %s437_s2, 4  ;;  %s308_s24 = smov [#allocation8]   ;;  %s208_s21 = int_to_ptr.hbm [resolvable:$true] %s207_s21 }
   0xd   :  { %v54_v2 = vld [vmem:[#allocation3 + $0x10] sm:$0xff]  ;;  %v55_v3 = vld [vmem:[#allocation3 + $0x18] sm:$0xff]  ;;  %v56_v4 = vld [vmem:[#allocation3 + $0x20] sm:$0xff] }
   0xe   :  { %v57_v5 = vld [vmem:[#allocation3 + $0x28] sm:$0xff]  ;;  %v58_v6 = vld [vmem:[#allocation3 + $0x30] sm:$0xff]  ;;  %v59_v7 = vld [vmem:[#allocation3 + $0x38] sm:$0xff] }
   0xf   :  { %v60_v8 = vld [vmem:[#allocation3 + $0x40] sm:$0xff]  ;;  %v61_v9 = vld [vmem:[#allocation3 + $0x48] sm:$0xff]  ;;  %v62_v10 = vld [vmem:[#allocation3 + $0x50] sm:$0xff] }
  0x10   :  { %v63_v11 = vld [vmem:[#allocation3 + $0x58] sm:$0xff]  ;;  %v64_v12 = vld [vmem:[#allocation6] sm:$0xff]  ;;  %v65_v13 = vld [vmem:[#allocation6 + $0x8] sm:$0xff] }
  0x11   :  { %v66_v14 = vld [vmem:[#allocation6 + $0x10] sm:$0xff]  ;;  %v67_v15 = vld [vmem:[#allocation6 + $0x18] sm:$0xff]  ;;  %v68_v16 = vld [vmem:[#allocation6 + $0x20] sm:$0xff]  ;;  %v330_v18 = vsub.f32 %v52_v0, %v64_v12  ;;  %v332_v19 = vsub.f32 %v53_v1, %v65_v13 }
  0x12   :  { %v69_v17 = vld [vmem:[#allocation6 + $0x28] sm:$0xff]  ;;  %v334_v20 = vsub.f32 %v54_v2, %v66_v14  ;;  %v70_v21 = vld [vmem:[#allocation6 + $0x30] sm:$0xff]  ;;  %v71_v22 = vld [vmem:[#allocation6 + $0x38] sm:$0xff]  ;;  %v336_v24 = vsub.f32 %v55_v3, %v67_v15  ;;  %v338_v25 = vsub.f32 %v56_v4, %v68_v16 }
  0x13   :  { %v72_v23 = vld [vmem:[#allocation6 + $0x40] sm:$0xff]  ;;  %v340_v26 = vsub.f32 %v57_v5, %v69_v17  ;;  %v73_v27 = vld [vmem:[#allocation6 + $0x48] sm:$0xff]  ;;  %v74_v28 = vld [vmem:[#allocation6 + $0x50] sm:$0xff]  ;;  %v82_v30 = vsub.f32 %v58_v6, %v70_v21  ;;  %v83_v31 = vsub.f32 %v59_v7, %v71_v22  ;;  %v88_v35 = vand.u32 2147483647, %v330_v18 }
  0x14   :  { %v75_v29 = vld [vmem:[#allocation6 + $0x58] sm:$0xff]  ;;  %v84_v32 = vsub.f32 %v60_v8, %v72_v23  ;;  %v85_v33 = vsub.f32 %v61_v9, %v73_v27  ;;  %v86_v34 = vsub.f32 %v62_v10, %v74_v28  ;;  %v89_v36 = vand.u32 2147483647, %v332_v19 }
  0x15   :  { %v87_v37 = vsub.f32 %v63_v11, %v75_v29  ;;  %v90_v38 = vand.u32 2147483647, %v334_v20  ;;  %v91_v39 = vand.u32 2147483647, %v336_v24  ;;  %v92_v40 = vand.u32 2147483647, %v338_v25 }
  0x16   :  { %v93_v41 = vand.u32 2147483647, %v340_v26  ;;  %v94_v42 = vand.u32 2147483647, %v82_v30  ;;  %v95_v43 = vand.u32 2147483647, %v83_v31 }
  0x17   :  { %v96_v44 = vand.u32 2147483647, %v84_v32  ;;  %v97_v45 = vand.u32 2147483647, %v85_v33  ;;  %v98_v46 = vand.u32 2147483647, %v86_v34 }
  0x18   :  { %v99_v47 = vand.u32 2147483647, %v87_v37  ;;  %vm348_vm0 = vcmp.lt.f32.partialorder %v88_v35, 1.0  ;;  %vm352_vm1 = vcmp.lt.f32.partialorder %v89_v36, 1.0  ;;  %vm356_vm2 = vcmp.lt.f32.partialorder %v90_v38, 1.0 }
  0x19   :  { %vm360_vm3 = vcmp.lt.f32.partialorder %v91_v39, 1.0  ;;  %vm364_vm4 = vcmp.lt.f32.partialorder %v92_v40, 1.0  ;;  %vm368_vm5 = vcmp.lt.f32.partialorder %v93_v41, 1.0  ;;  %vm372_vm6 = vcmp.lt.f32.partialorder %v94_v42, 1.0 }
  0x1a   :  { %vm376_vm7 = vcmp.lt.f32.partialorder %v95_v43, 1.0  ;;  %vm380_vm8 = vcmp.lt.f32.partialorder %v96_v44, 1.0  ;;  %vm384_vm9 = vcmp.lt.f32.partialorder %v97_v45, 1.0  ;;  %vm388_vm10 = vcmp.lt.f32.partialorder %v98_v46, 1.0 }
  0x1b   :  { %v112_v59 = vmul.f32 0.5, %v330_v18  ;;  %v113_v60 = vmul.f32 0.5, %v332_v19  ;;  %v114_v61 = vmul.f32 0.5, %v334_v20  ;;  %v115_v62 = vmul.f32 0.5, %v336_v24 }
  0x1c   :  { %v116_v63 = vmul.f32 0.5, %v338_v25  ;;  %v117_v0 = vmul.f32 0.5, %v340_v26  ;;  %v118_v1 = vmul.f32 0.5, %v82_v30  ;;  %vm398_vm11 = vcmp.lt.f32.partialorder %v99_v47, 1.0 }
  0x1d   :  { %v119_v3 = vmul.f32 0.5, %v83_v31  ;;  %v120_v4 = vmul.f32 0.5, %v84_v32  ;;  %v121_v5 = vmul.f32 0.5, %v85_v33  ;;  %v122_v6 = vmul.f32 0.5, %v86_v34 }
  0x1e   :  { %v123_v7 = vmul.f32 0.5, %v87_v37  ;;  %v124_v8 = vmul.f32 %v112_v59, %v330_v18  ;;  %v125_v9 = vmul.f32 %v113_v60, %v332_v19  ;;  %v126_v10 = vmul.f32 %v114_v61, %v334_v20 }
  0x1f   :  { %v127_v11 = vmul.f32 %v115_v62, %v336_v24  ;;  %v128_v12 = vmul.f32 %v116_v63, %v338_v25  ;;  %v129_v13 = vmul.f32 %v117_v0, %v340_v26  ;;  %v130_v14 = vmul.f32 %v118_v1, %v82_v30 }
  0x20   :  { %v131_v15 = vmul.f32 %v119_v3, %v83_v31  ;;  %v132_v16 = vmul.f32 %v120_v4, %v84_v32  ;;  %v133_v17 = vmul.f32 %v121_v5, %v85_v33  ;;  %v134_v21 = vmul.f32 %v122_v6, %v86_v34 }
  0x21   :  { %v135_v22 = vmul.f32 %v123_v7, %v87_v37  ;;  %v219_v23 = vadd.f32 -0.5, %v88_v35  ;;  %v220_v27 = vadd.f32 -0.5, %v89_v36  ;;  %v221_v28 = vadd.f32 -0.5, %v90_v38 }
  0x22   :  { %v222_v18 = vadd.f32 -0.5, %v91_v39  ;;  %v223_v29 = vadd.f32 -0.5, %v92_v40  ;;  %v224_v19 = vadd.f32 -0.5, %v93_v41  ;;  %v225_v59 = vadd.f32 -0.5, %v94_v42 }
  0x23   :  { %v226_v20 = vadd.f32 -0.5, %v95_v43  ;;  %v227_v60 = vadd.f32 -0.5, %v96_v44  ;;  %v228_v24 = vadd.f32 -0.5, %v97_v45  ;;  %v229_v61 = vadd.f32 -0.5, %v98_v46 }
  0x24   :  { %v230_v25 = vadd.f32 -0.5, %v99_v47  ;;  %v148_v26 = vsel %vm348_vm0, %v124_v8, %v219_v23  ;;  %v149_v30 = vsel %vm352_vm1, %v125_v9, %v220_v27  ;;  %v150_v31 = vsel %vm356_vm2, %v126_v10, %v221_v28 }
  0x25   :  { %v151_v32 = vsel %vm360_vm3, %v127_v11, %v222_v18  ;;  %v152_v33 = vsel %vm364_vm4, %v128_v12, %v223_v29  ;;  %v153_v34 = vsel %vm368_vm5, %v129_v13, %v224_v19  ;;  %v154_v35 = vsel %vm372_vm6, %v130_v14, %v225_v59 }
  0x26   :  { %v155_v36 = vsel %vm376_vm7, %v131_v15, %v226_v20  ;;  %v156_v37 = vsel %vm380_vm8, %v132_v16, %v227_v60  ;;  %v157_v38 = vsel %vm384_vm9, %v133_v17, %v228_v24  ;;  %v158_v39 = vsel %vm388_vm10, %v134_v21, %v229_v61 }
  0x27   :  { %v164_v40 = vadd.f32 %v152_v33, %v148_v26  ;;  %v166_v41 = vadd.f32 %v153_v34, %v149_v30  ;;  %v168_v42 = vadd.f32 %v154_v35, %v150_v31  ;;  %v159_v43 = vsel %vm398_vm11, %v135_v22, %v230_v25 }
  0x28   :  { %v170_v44 = vadd.f32 %v155_v36, %v151_v32 }
  0x29   :  { %v165_v45 = vadd.f32 %v164_v40, %v156_v37  ;;  %v167_v46 = vadd.f32 %v166_v41, %v157_v38  ;;  %v169_v47 = vadd.f32 %v168_v42, %v158_v39 }
  0x2a   :  { %v171_v48 = vadd.f32 %v170_v44, %v159_v43 }
  0x2b   :  { %v187_v49 = vadd.f32 %v167_v46, %v165_v45 }
  0x2d   :  { %v188_v50 = vadd.f32 %v187_v49, %v169_v47 }
  0x2f   :  { %v189_v51 = vadd.f32 %v188_v50, %v171_v48 }
  0x31   :  { %190 = vadd.xlane.f32.xlu0 %v189_v51 }
  0xa4   :  { %v191_v52 = vpop.xlane.xlu0 %190 }
  0xa5   :  { %v192_v53 = vrot.slane %v191_v52, 4 }
  0xa7   :  { %v193_v54 = vadd.f32 %v192_v53, %v191_v52 }
  0xa9   :  { %v194_v55 = vrot.slane %v193_v54, 2 }
  0xab   :  { %v195_v56 = vadd.f32 %v194_v55, %v193_v54 }
  0xad   :  { %v196_v57 = vrot.slane %v195_v56, 1 }
  0xaf   :  { %v197_v58 = vadd.f32 %v196_v57, %v195_v56 }
  0xb1   :  { %231 = vpush %v197_v58 }
  0xe2   :  { %s232_s22 = spop %231 }
  0xe3   :  { %s199_s23 = smul.f32 8.138021e-05, %s232_s22 }
  0xe5   :  { %201 = sst [smem:[#allocation8]] %s199_s23 }
  0xe6   :  { %210 = dma.smem_to_hbm %s308_s24, 16, %s208_s21, [#allocation5]  }
  0xe7   :  { %302 = dma.done.wait [#allocation5], 16  }
  0xe8   :  { %303 = vsyncadd [#allocation5], 4294967280 }
  0xe9   :  { %215 = sfence }
  0xea   :  { %216 = vsyncpa [#allocation4], 1 }
  0xeb   :  { %217 = vsyncpa [#allocation7], 1 }
  0xec   :  { %218 = vsyncpa [#allocation5], 1 }

</bundles_post_ra>
